<compile_context>
chip_gen: v7x
topology: tpu7x:2x2x1
jax: 0.10.0
libtpu: 0.0.40
codegen_flags: <defaults>
</compile_context>

<pallas_src>
import functools

import jax
import jax.numpy as jnp
from jax import lax
from jax.experimental import pallas as pl
from jax.experimental.pallas import tpu as pltpu


def _round_up(v, m):
    return -(-v // m) * m


def _tpu_generation():
    """Best-effort TPU generation from device_kind (None if unknown)."""
    try:
        kind = jax.devices()[0].device_kind.lower()
    except Exception:
        return None
    for tag, gen in (("v7", 7), ("v6", 6), ("v5", 5), ("v4", 4), ("v3", 3),
                     ("v2", 2)):
        if tag in kind:
            return gen
    return None


def _vmem_budget_and_cap(gen):
    """(block-sizing budget, vmem_limit cap) in bytes, per TPU generation."""
    if gen is None:
        return 16 << 20, 64 << 20
    if gen >= 7:            # v7x: 64 MiB physical per TensorCore
        return 24 << 20, 48 << 20
    if gen == 6:            # v6e: 128 MiB physical -> push toward roofline
        return 64 << 20, 110 << 20
    # v5e and older: tightest scoped default (16 MiB); raise it explicitly
    # but keep the per-step working set modest.
    return 20 << 20, 96 << 20


def _per_step_vmem_bytes(tb, cp, d, h, x_isz, mm_isz, act_isz, has_mask):
    """Conservative per-grid-step VMEM footprint estimate (bytes)."""
    dp = _round_up(d, 128)
    hp = _round_up(h, 128)
    tb8 = _round_up(tb, 8)
    total = 2 * tb8 * cp * dp * x_isz                  # double-buffered x slab
    if has_mask:
        total += 2 * tb8 * _round_up(cp, 128) * 4      # double-buffered mask
    total += 2 * _round_up(d, 8) * hp * mm_isz         # W1^T (2 bufs even if constant)
    total += 2 * 2 * 8 * hp * 4                        # b1 + w2 rows (2 bufs)
    total += 2 * tb8 * dp * 4                          # double-buffered out slab
    # In-kernel temporaries: matmul-operand cast, f32 matmul acc + e, x*alpha.
    total += tb * cp * dp * mm_isz
    total += tb * cp * hp * (4 + act_isz)
    total += tb * cp * dp * 4
    return total


def _choose_block_batch(B, cp, d, h, x_isz, mm_isz, act_isz, has_mask, budget):
    """Batches per grid step: largest 8-aligned block within the VMEM budget,
    preferring an even grid of >= 4 steps (>= 2 pipelined steps per v7x TC)."""
    if B <= 8:
        return B
    cap = min((B // 8) * 8, 2048)
    max_tb = 8
    while (max_tb + 8 <= cap and
           _per_step_vmem_bytes(max_tb + 8, cp, d, h, x_isz, mm_isz, act_isz,
                                has_mask) <= budget):
        max_tb += 8
    best_key, best_tb = None, 8
    for cand in range(8, max_tb + 1, 8):
        steps = -(-B // cand)
        key = (steps >= 4 and steps % 2 == 0,
               steps >= 4,
               steps >= 2 and steps % 2 == 0,
               steps >= 2,
               cand)                     # then prefer the largest block
        if best_key is None or key > best_key:
            best_key, best_tb = key, cand
    return best_tb


def _ckt_additive_attention_kernel(*refs, batch_size, block_batch, has_mask,
                                   act_dtype, mm_dtype, precise):
    if has_mask:
        x_ref, mask_ref, w1t_ref, b1_ref, w2_ref, b2_ref, o_ref = refs
    else:
        x_ref, w1t_ref, b1_ref, w2_ref, b2_ref, o_ref = refs
        mask_ref = None

    TB, Cp, D = x_ref.shape

    x = x_ref[...]                                    # (TB, Cp, D), native dtype
    xf = x.reshape(TB * Cp, D)                        # layout-free: Cp sublane-aligned
    if mm_dtype is not None and xf.dtype != mm_dtype:
        xf = xf.astype(mm_dtype)

    # fc1 + tanh: one big (TB*Cp, D) @ (D, H) MXU matmul, f32 accumulation.
    pre = jnp.dot(xf, w1t_ref[...], preferred_element_type=jnp.float32)
    e = jnp.tanh((pre + b1_ref[...]).astype(act_dtype))      # (TB*Cp, H)

    # fc2 (H -> 1): VPU multiply + XLU lane reduce (f32 accumulate), b2 in SMEM.
    score = (jnp.sum(e * w2_ref[...], axis=-1, keepdims=True,
                     dtype=jnp.float32) + b2_ref[0])          # (TB*Cp, 1) f32

    # exp + mask; keep alpha un-normalized, normalize after aggregation.
    alpha = jnp.exp(score).reshape(TB, Cp, 1)                 # (TB, Cp, 1) f32
    if has_mask:
        alpha = alpha * mask_ref[...][..., None]
    if batch_size % block_batch != 0:
        # Ragged last block: zero contributions of out-of-range batch rows.
        row = (pl.program_id(0) * block_batch
               + lax.broadcasted_iota(jnp.int32, (TB, 1, 1), 0))
        alpha = jnp.where(row < batch_size, alpha, 0.0)

    denom = jnp.sum(alpha, axis=1) + 1e-8                     # (TB, 1)
    acc = jnp.sum(x * alpha, axis=1)                          # (TB, D) f32 (promoted)
    inv = pl.reciprocal(denom, approx=not precise)
    o_ref[...] = (acc * inv).astype(o_ref.dtype)


def ckt_additive_attention(x, attn_mask, w1, b1, w2, b2, *,
                           block_batch=None,
                           matmul_dtype=jnp.bfloat16,
                           activation_dtype=None):
    """Additive attention pooling (CKTAdditiveAttention forward).

    x: (B, C, D) float array (kept in its native dtype; not upcast here).
    attn_mask: (B, C) or None.
    w1: (H, D), b1: (H,), w2: (1, H), b2: (1,)  -- PyTorch nn.Linear layout.
    Returns (B, D) in x.dtype.

    matmul_dtype: operand dtype of the fc1 MXU matmul (bf16 default; None =>
      f32 operands for exact parity with an f32 reference).
    activation_dtype: dtype of the tanh / e*w2 path. None => auto: bf16 on
      v6e/v7x (bf16 VPU/EUP), f32 on v5e and unknown chips.
    """
    x = jnp.asarray(x)
    if not jnp.issubdtype(x.dtype, jnp.floating):
        x = x.astype(jnp.float32)
    B, C, D = x.shape
    H = w1.shape[0]

    gen = _tpu_generation()
    if activation_dtype is None:
        activation_dtype = (jnp.bfloat16 if (gen is not None and gen >= 6)
                            else jnp.float32)
    act_dtype = jnp.dtype(activation_dtype)
    mm_dtype = None if matmul_dtype is None else jnp.dtype(matmul_dtype)
    precise = (mm_dtype is None and act_dtype == jnp.dtype(jnp.float32))

    # Pad C to the sublane tile so the in-kernel flatten/reshape is layout-free.
    c_align = 8 if x.dtype.itemsize >= 4 else (16 if x.dtype.itemsize == 2 else 32)
    Cp = _round_up(C, c_align)

    has_mask = (attn_mask is not None) or (Cp != C)
    mask = None
    if has_mask:
        if attn_mask is None:
            mask = jnp.ones((B, C), jnp.float32)
        else:
            mask = jnp.asarray(attn_mask, jnp.float32).reshape(B, C)
        if Cp != C:
            mask = jnp.pad(mask, ((0, 0), (0, Cp - C)))  # padded candidates -> 0
    if Cp != C:
        x = jnp.pad(x, ((0, 0), (0, Cp - C), (0, 0)))

    # Weights: one-time transpose / cast in the wrapper (small matrices).
    w1t = jnp.asarray(w1, jnp.float32).T                 # (D, H)
    if mm_dtype is not None:
        w1t = w1t.astype(mm_dtype)
    b1r = jnp.asarray(b1, jnp.float32).reshape(1, H)
    w2r = jnp.asarray(w2, jnp.float32).reshape(1, H).astype(act_dtype)
    b2s = jnp.asarray(b2, jnp.float32).reshape(1,)       # SMEM scalar

    budget, vmem_cap = _vmem_budget_and_cap(gen)
    x_isz = x.dtype.itemsize
    mm_isz = x_isz if mm_dtype is None else mm_dtype.itemsize
    act_isz = act_dtype.itemsize

    if block_batch is None:
        TB = _choose_block_batch(B, Cp, D, H, x_isz, mm_isz, act_isz,
                                 has_mask, budget)
    else:
        TB = max(1, min(int(block_batch), B))
        if TB < B and TB % 8 != 0:
            TB = max(8, (TB // 8) * 8)   # 2nd-minor block dim must be 8-aligned

    # No batch-axis jnp.pad of x: a ragged last block is handled in-kernel
    # with a row-validity mask; out-of-range output rows are never stored.
    grid = (pl.cdiv(B, TB),)

    est = _per_step_vmem_bytes(TB, Cp, D, H, x_isz, mm_isz, act_isz, has_mask)
    vmem_limit = int(min(vmem_cap, max(32 << 20, est + (est >> 1) + (4 << 20))))

    kernel = functools.partial(
        _ckt_additive_attention_kernel,
        batch_size=B, block_batch=TB, has_mask=has_mask,
        act_dtype=act_dtype, mm_dtype=mm_dtype, precise=precise)

    in_specs = [pl.BlockSpec((TB, Cp, D), lambda b: (b, 0, 0))]      # x slab
    operands = [x]
    if has_mask:
        in_specs.append(pl.BlockSpec((TB, Cp), lambda b: (b, 0)))    # 2-D mask
        operands.append(mask)
    in_specs += [
        pl.BlockSpec((D, H), lambda b: (0, 0)),                      # W1^T
        pl.BlockSpec((1, H), lambda b: (0, 0)),                      # b1 row
        pl.BlockSpec((1, H), lambda b: (0, 0)),                      # w2 row
        pl.BlockSpec(memory_space=pltpu.MemorySpace.SMEM),           # b2 scalar
    ]
    operands += [w1t, b1r, w2r, b2s]

    out = pl.pallas_call(
        kernel,
        out_shape=jax.ShapeDtypeStruct((B, D), x.dtype),
        grid=grid,
        in_specs=in_specs,
        out_specs=pl.BlockSpec((TB, D), lambda b: (b, 0)),           # dense out slab
        compiler_params=pltpu.CompilerParams(
            dimension_semantics=("parallel",),
            vmem_limit_bytes=vmem_limit),
    )(*operands)
    return out


def _reference(x, attn_mask, w1, b1, w2, b2):
    """Pure-JAX f32 reference of the (documented / batched) forward."""
    e = jnp.tanh(jnp.einsum("bcd,hd->bch", x, w1) + b1)      # (B, C, H)
    alpha = jnp.exp(jnp.einsum("bch,oh->bco", e, w2) + b2)   # (B, C, 1)
    if attn_mask is not None:
        alpha = alpha * attn_mask[..., None]
    alpha = alpha / (jnp.sum(alpha, axis=1, keepdims=True) + 1e-8)
    return jnp.einsum("bcd,bc->bd", x, alpha[..., 0])


if __name__ == "__main__":
    # Small shapes consistent with the module: 16 batches, 8 candidates,
    # d_h=32, hidden_size=128.  Auto block sizing gives TB=8 -> grid=(2,).
    B, C, D, H = 16, 8, 32, 128

    key = jax.random.PRNGKey(0)
    kx, kw1, kb1, kw2, kb2 = jax.random.split(key, 5)

    x = jax.random.normal(kx, (B, C, D), dtype=jnp.float32)

    # Deterministic synthetic params (nn.Linear shapes: weight (out, in)).
    bound1 = 1.0 / (D ** 0.5)
    w1 = jax.random.uniform(kw1, (H, D), jnp.float32, -bound1, bound1)
    b1 = jax.random.uniform(kb1, (H,), jnp.float32, -bound1, bound1)
    bound2 = 1.0 / (H ** 0.5)
    w2 = jax.random.uniform(kw2, (1, H), jnp.float32, -bound2, bound2)
    b2 = jax.random.uniform(kb2, (1,), jnp.float32, -bound2, bound2)

    # Attention mask: a couple of batches with masked-out candidates.
    attn_mask = (jnp.ones((B, C), jnp.float32)
                 .at[1, C - 3:].set(0.0)
                 .at[5, :4].set(0.0))

    ref = _reference(x, attn_mask, w1, b1, w2, b2)

    # 1) Default fast path: bf16 MXU operands (+ bf16 elementwise on v6e/v7x),
    #    approx reciprocal.  Loose tolerance vs. the f32 reference.
    out_fast = jax.block_until_ready(
        ckt_additive_attention(x, attn_mask, w1, b1, w2, b2))
    assert out_fast.shape == (B, D)
    assert jnp.allclose(out_fast, ref, atol=5e-2, rtol=5e-2), (
        f"fast path max abs err = {jnp.max(jnp.abs(out_fast - ref))}")

    # 2) Full-precision path: exact parity with the f32 reference.
    out_exact = jax.block_until_ready(
        ckt_additive_attention(x, attn_mask, w1, b1, w2, b2,
                               matmul_dtype=None,
                               activation_dtype=jnp.float32))
    assert jnp.allclose(out_exact, ref, atol=2e-5, rtol=2e-5), (
        f"exact path max abs err = {jnp.max(jnp.abs(out_exact - ref))}")

    # 3) attn_mask=None path (no mask operand is passed to the kernel).
    out_nm = jax.block_until_ready(
        ckt_additive_attention(x, None, w1, b1, w2, b2,
                               matmul_dtype=None,
                               activation_dtype=jnp.float32))
    ref_nm = _reference(x, None, w1, b1, w2, b2)
    assert jnp.allclose(out_nm, ref_nm, atol=2e-5, rtol=2e-5), (
        f"no-mask max abs err = {jnp.max(jnp.abs(out_nm - ref_nm))}")

    # 4) Ragged batch (B not a multiple of the block): exercises the in-kernel
    #    row mask + bounded stores instead of a wrapper-side jnp.pad of x.
    Br = 13
    out_rg = jax.block_until_ready(
        ckt_additive_attention(x[:Br], attn_mask[:Br], w1, b1, w2, b2,
                               matmul_dtype=None,
                               activation_dtype=jnp.float32,
                               block_batch=8))
    ref_rg = _reference(x[:Br], attn_mask[:Br], w1, b1, w2, b2)
    assert out_rg.shape == (Br, D)
    assert jnp.allclose(out_rg, ref_rg, atol=2e-5, rtol=2e-5), (
        f"ragged max abs err = {jnp.max(jnp.abs(out_rg - ref_rg))}")

    print("KERNEL_OK")
</pallas_src>

<mosaic_0001>
module attributes {stable_mosaic.version = 11 : i64} {
  func.func @_ckt_additive_attention_kernel(%arg0: i32, %arg1: memref<8x8x32xf32, #tpu.memory_space<vmem>>, %arg2: memref<8x8xf32, #tpu.memory_space<vmem>>, %arg3: memref<32x128xbf16, #tpu.memory_space<vmem>>, %arg4: memref<1x128xf32, #tpu.memory_space<vmem>>, %arg5: memref<1x128xf32, #tpu.memory_space<vmem>>, %arg6: memref<1xf32, #tpu.memory_space<smem>>, %arg7: memref<8x32xf32, #tpu.memory_space<vmem>>) attributes {dimension_semantics = [#tpu.dimension_semantics<parallel>], iteration_bounds = array<i64: 2>, scalar_prefetch = 0 : i64, scratch_operands = 0 : i64, tpu.core_type = #tpu.core_type<tc>, window_params = [{transform_indices = @transform_0, window_bounds = array<i64: 8, 8, 32>}, {transform_indices = @transform_1, window_bounds = array<i64: 8, 8>}, {pipeline_mode = #tpu.pipeline_mode<synchronous>, transform_indices = @transform_2, window_bounds = array<i64: 32, 128>}, {pipeline_mode = #tpu.pipeline_mode<synchronous>, transform_indices = @transform_3, window_bounds = array<i64: 1, 128>}, {pipeline_mode = #tpu.pipeline_mode<synchronous>, transform_indices = @transform_4, window_bounds = array<i64: 1, 128>}, {transform_indices = @transform_5, window_bounds = array<i64: 1>}, {transform_indices = @transform_6, window_bounds = array<i64: 8, 32>}]} {
    %c0 = arith.constant 0 : index
    %c0_0 = arith.constant 0 : index
    %c0_1 = arith.constant 0 : index
    %0 = vector.load %arg1[%c0, %c0_0, %c0_1] : memref<8x8x32xf32, #tpu.memory_space<vmem>>, vector<8x8x32xf32>
    %1 = vector.shape_cast %0 : vector<8x8x32xf32> to vector<64x32xf32>
    %2 = arith.truncf %1 : vector<64x32xf32> to vector<64x32xbf16>
    %c0_2 = arith.constant 0 : index
    %c0_3 = arith.constant 0 : index
    %3 = vector.load %arg3[%c0_2, %c0_3] : memref<32x128xbf16, #tpu.memory_space<vmem>>, vector<32x128xbf16>
    %cst = arith.constant dense<0.000000e+00> : vector<64x128xf32>
    %4 = tpu.matmul %2, %3, %cst {dimension_numbers = #tpu.dot_dimension_numbers<[1], [0], [0], [1], [0, 0, 1, 1], [], []>} : vector<64x32xbf16>, vector<32x128xbf16>, vector<64x128xf32> -> vector<64x128xf32>
    %c0_4 = arith.constant 0 : index
    %c0_5 = arith.constant 0 : index
    %5 = vector.load %arg4[%c0_4, %c0_5] : memref<1x128xf32, #tpu.memory_space<vmem>>, vector<1x128xf32>
    %6 = vector.broadcast %5 : vector<1x128xf32> to vector<64x128xf32>
    %7 = arith.addf %4, %6 : vector<64x128xf32>
    %8 = math.tanh %7 : vector<64x128xf32>
    %c0_6 = arith.constant 0 : index
    %c0_7 = arith.constant 0 : index
    %9 = vector.load %arg5[%c0_6, %c0_7] : memref<1x128xf32, #tpu.memory_space<vmem>>, vector<1x128xf32>
    %10 = vector.broadcast %9 : vector<1x128xf32> to vector<64x128xf32>
    %11 = arith.mulf %8, %10 : vector<64x128xf32>
    %cst_8 = arith.constant dense<0.000000e+00> : vector<64xf32>
    %12 = vector.multi_reduction <add>, %11, %cst_8 [1] : vector<64x128xf32> to vector<64xf32>
    %13 = vector.shape_cast %12 : vector<64xf32> to vector<64x1xf32>
    %c0_9 = arith.constant 0 : index
    %14 = memref.load %arg6[%c0_9] : memref<1xf32, #tpu.memory_space<smem>>
    %15 = vector.broadcast %14 : f32 to vector<64x1xf32>
    %16 = arith.addf %13, %15 : vector<64x1xf32>
    %17 = math.exp %16 : vector<64x1xf32>
    %18 = vector.shape_cast %17 : vector<64x1xf32> to vector<8x8x1xf32>
    %c0_10 = arith.constant 0 : index
    %c0_11 = arith.constant 0 : index
    %19 = vector.load %arg2[%c0_10, %c0_11] : memref<8x8xf32, #tpu.memory_space<vmem>>, vector<8x8xf32>
    %20 = vector.shape_cast %19 : vector<8x8xf32> to vector<8x8x1xf32>
    %21 = arith.mulf %18, %20 : vector<8x8x1xf32>
    %cst_12 = arith.constant dense<0.000000e+00> : vector<8x1xf32>
    %22 = vector.multi_reduction <add>, %21, %cst_12 [1] : vector<8x8x1xf32> to vector<8x1xf32>
    %cst_13 = arith.constant 9.99999993E-9 : f32
    %23 = vector.broadcast %cst_13 : f32 to vector<8x1xf32>
    %24 = arith.addf %22, %23 : vector<8x1xf32>
    %25 = vector.broadcast %21 : vector<8x8x1xf32> to vector<8x8x32xf32>
    %26 = arith.mulf %0, %25 : vector<8x8x32xf32>
    %cst_14 = arith.constant dense<0.000000e+00> : vector<8x32xf32>
    %27 = vector.multi_reduction <add>, %26, %cst_14 [1] : vector<8x8x32xf32> to vector<8x32xf32>
    %28 = tpu.reciprocal %24 {approx = true} : vector<8x1xf32> -> vector<8x1xf32>
    %29 = vector.broadcast %28 : vector<8x1xf32> to vector<8x32xf32>
    %30 = arith.mulf %27, %29 : vector<8x32xf32>
    %c0_15 = arith.constant 0 : index
    %c0_16 = arith.constant 0 : index
    %31 = vector.load %arg7[%c0_15, %c0_16] : memref<8x32xf32, #tpu.memory_space<vmem>>, vector<8x32xf32>
    tpu.vector_store %arg7[%c0_15, %c0_16], %30 {strides = array<i32>} : memref<8x32xf32, #tpu.memory_space<vmem>>, vector<8x32xf32>,
    return
  }
  func.func @transform_0(%arg0: i32) -> (i32, i32, i32) {
    %c0_i32 = arith.constant 0 : i32
    %c0_i32_0 = arith.constant 0 : i32
    %c0_i32_1 = arith.constant 0 : i32
    return %arg0, %c0_i32, %c0_i32_0 : i32, i32, i32
  }
  func.func @transform_1(%arg0: i32) -> (i32, i32) {
    %c0_i32 = arith.constant 0 : i32
    %c0_i32_0 = arith.constant 0 : i32
    return %arg0, %c0_i32 : i32, i32
  }
  func.func @transform_2(%arg0: i32) -> (i32, i32) {
    %c0_i32 = arith.constant 0 : i32
    %c0_i32_0 = arith.constant 0 : i32
    %c0_i32_1 = arith.constant 0 : i32
    return %c0_i32, %c0_i32_0 : i32, i32
  }
  func.func @transform_3(%arg0: i32) -> (i32, i32) {
    %c0_i32 = arith.constant 0 : i32
    %c0_i32_0 = arith.constant 0 : i32
    %c0_i32_1 = arith.constant 0 : i32
    return %c0_i32, %c0_i32_0 : i32, i32
  }
  func.func @transform_4(%arg0: i32) -> (i32, i32) {
    %c0_i32 = arith.constant 0 : i32
    %c0_i32_0 = arith.constant 0 : i32
    %c0_i32_1 = arith.constant 0 : i32
    return %c0_i32, %c0_i32_0 : i32, i32
  }
  func.func @transform_5(%arg0: i32) -> i32 {
    %c0_i32 = arith.constant 0 : i32
    %c0_i32_0 = arith.constant 0 : i32
    return %c0_i32 : i32
  }
  func.func @transform_6(%arg0: i32) -> (i32, i32) {
    %c0_i32 = arith.constant 0 : i32
    %c0_i32_0 = arith.constant 0 : i32
    return %arg0, %c0_i32 : i32, i32
  }
}

</mosaic_0001>

<bundles_post_ra>
// kernel: tpu_custom_call.1
= control target key start
LH: loop header
LB: loop body
LE: loop exit
PB: predicated region body
PF: predicated region fallthrough
CT: control target
= control target key end

     0   :  { %s1315_s0 = inlined_call_operand.hbm [shape: f32[16,8,32], index: 0, kind: input, shape index: {}]   ;;  %s1316_s1 = inlined_call_operand.vmem [shape: f32[16,8], index: 1, kind: input, shape index: {}]   ;;  %s1317_s2 = inlined_call_operand.vmem [shape: bf16[32,128], index: 2, kind: input, shape index: {}]   ;;  %s1318_s3 = inlined_call_operand.vmem [shape: f32[1,128], index: 3, kind: input, shape index: {}]   ;;  %s1319_s4 = inlined_call_operand.vmem [shape: f32[1,128], index: 4, kind: input, shape index: {}]   ;;  %s1320_s5 = inlined_call_operand.<no memory space> [shape: f32[1], index: 5, kind: input, shape index: {}]   ;;  %s1321_s6 = inlined_call_operand.hbm [shape: f32[16,32], index: 6, kind: output, shape index: {}]  }
   0x1   :  { %11 = sst [smem:[#allocation2]] %s1320_s5 }
   0x2   :  { %12 = vsyncpa [#allocation4], 0 }
   0x3   :  { %14 = vsyncpa [#allocation4 + $0x1], 0 }
   0x4   :  { %15 = vsyncpa [#allocation5], 0 }
   0x5   :  { %17 = vsyncpa [#allocation5 + $0x1], 0  ;;  %s1072_s23 = smov 0   ;;  %s1074_s24 = smov 0  }
   0x6   :  { %s1076_s25 = smov 0   ;;  %s1078_s26 = smov 0  }
   0x7 LB: > { %s1093_s5 = sadd.s32 4294967295, %s1028_s26   ;;  %s789_s27 = sadd.s32 4294967294, %s1028_s26   ;;  %s1028_s26 = sphi %s1078_s26, %s1334_s26   ;;  %s1024_s25 = sphi %s1076_s25, %s1333_s25   ;;  %s1020_s24 = sphi %s1074_s24, %s1332_s24   ;;  %s1016_s23 = sphi %s1072_s23, %s1331_s23  }
   0x8   : > { %s1097_s28 = sadd.s32 1, %s1028_s26   ;;  %s30_s29 = sadd.s32 1, %s1024_s25 }
   0x9   : > { %s27_s30 = ssub.s32 %s1028_s26, %s1097_s28  ;;  %p37_p0 = scmp.ne.s32.totalorder %s1024_s25, %s1020_s24 }
   0xa   : > { %p28_p1 = scmp.eq.s32.totalorder %s27_s30, 0  ;;  %p38_p2 = scmp.eq.s32.totalorder %s1028_s26, 0 }
   0xb   : > { %p43_p3 = scmp.ne.s32.totalorder %s1020_s24, %s1016_s23  ;;  %p44_p4 = scmp.eq.s32.totalorder %s1093_s5, 0 }
   0xc   : > { %s1109_s7 = scalar_select %p28_p1, %s1024_s25, %s30_s29  }
   0xd   : > { %p1111_p5 = por %p38_p2, %p37_p0  ;;  %p1115_p6 = por %p44_p4, %p43_p3 }
   0xe   : > { %p177_p7 = scmp.eq.s32.totalorder %s1093_s5, 1  ;;  %p183_p8 = scmp.eq.s32.totalorder %s789_s27, 1 }
   0xf   : > { %p846_p10 = scmp.lt.s32.totalorder %s1028_s26, 2  ;;  %s215_s12 = sand.u32 1, %s1024_s25  }
  0x10   : > { %p1122_p11 = por %p177_p7, %p37_p0  ;;  %p1126_p12 = por %p183_p8, %p43_p3 }
  0x11   : > { %s811_s13 = sshll.u32 %s1028_s26, 10  ;;  %s792_s14 = sshll.u32 %s215_s12, 6 }
  0x12   : > { %s1325_s10 = scalar_select %p1122_p11, 1, 0 }
  0x13   : > { %s1326_s11 = scalar_select %p1126_p12, 1, 0 }
  0x14   : > { %s1135_s17 = scalar_lea.hbm %s1315_s0, %s811_s13  ;;  %s219_s18 = scalar_lea.vmem [#allocation3], %s792_s14 }
  0x15   : > { %s226_s19 = sshll.u32 %s219_s18, 4  ;;  %p1139_p13 = pnand %p846_p10, %p1111_p5  ;;  %s1143_s19 = int_to_ptr.vmem [resolvable:$true] %s226_s19 }
  0x16   : > { %s1145_s21 = scalar_lea.sflag [#allocation4], %s215_s12  ;;  %s932_s22 = scalar_lea.hbm %s1135_s17, 1024 }
  0x17   : > { %p933_p0 = scmp.ne.s32.totalorder %s1135_s17, %s932_s22  ;;  %p934_p1 = pneg %p1139_p13 }
  0x18   : > { %s937_s30 = scalar_lea.hbm %s1315_s0, 2048  ;;  %p938_p4 = scmp.lt.u32.totalorder %s1135_s17, %s1315_s0 }
  0x19   : > { %p935_p2 = pnand %p934_p1, %p933_p0  ;;  %p939_p5 = scmp.lt.u32.totalorder %s937_s30, %s932_s22 }
  0x1a   : > { %p941_p8 = scmp.lt.u32.totalorder %s932_s22, %s1135_s17 }
  0x1b   : > { %p936_p3 = pneg %p935_p2  ;;  %p940_p7 = por %p939_p5, %p938_p4 }
  0x1d   : > { %p942_p10 = por %p941_p8, %p940_p7 }
  0x1f   : > { %p943_p9 = pnand %p942_p10, %p936_p3 }
  0x21   : > { %946 = shalt.err (!%p943_p9)
}
  0x22   : > { %s947_s12 = scalar_lea.vmem %s1143_s19, 1024  ;;  %s1030_s14 = smov [#allocation3]  }
  0x23   : > { %p948_p0 = scmp.ne.s32.totalorder %s1143_s19, %s947_s12  ;;  %s952_s15 = sshll.u32 %s1030_s14, 4  ;;  %s953_s15 = int_to_ptr.vmem [resolvable:$false] %s952_s15 }
  0x24   : > { %s954_s16 = scalar_lea.vmem %s953_s15, 2048  ;;  %p955_p11 = scmp.lt.s32.totalorder %s1143_s19, %s953_s15 }
  0x25   : > { %p950_p2 = pnand %p948_p0, %p934_p1  ;;  %p956_p4 = scmp.lt.s32.totalorder %s954_s16, %s947_s12 }
  0x27   : > { %p951_p12 = pneg %p950_p2  ;;  %p957_p5 = por %p956_p4, %p955_p11 }
  0x29   : > { %p958_p7 = pnand %p957_p5, %p951_p12 }
  0x2b   : > { %961 = shalt.err (!%p958_p7)
}
  0x2c   : > { %s1031_s18 = smov 128   ;;  %s1032_s22 = smov 8  }
  0x2d   : > { %841 = dma.hbm_to_vmem [thread:$0]  (!%p1139_p13), %s1135_s17, 1024, %s1143_s19, %s1145_s21, %s1031_s18, %s1031_s18, %s1032_s22  }
  0x2e   : > { %p795_p9 = scmp.ge.s32.totalorder %s1028_s26, 1  ;;  %p241_p1 = scmp.lt.s32.totalorder %s1028_s26, 3 }
  0x30   : > { %p242_p3 = pnand %p795_p9, %p241_p1 }
  0x31   : > { %s1176_s27 = sand.u32 (!%p242_p3), 1, %s1020_s24  }
  0x32   : > { %245 = sbr.rel (%p242_p3) target bundleno = 559 (0x22f), region = 44  ;;  %s796_s29 = sshll.u32 (!%p242_p3), %s1176_s27, 6 }
  0x33   : > { %s248_s30 = scalar_lea.sflag (!%p242_p3), [#allocation4], %s1176_s27  ;;  %s251_s8 = scalar_lea.vmem (!%p242_p3), [#allocation3], %s796_s29 }
  0x39   : > { %1007 = dma.done.wait (%p1115_p6), %s248_s30, 1024  }
  0x3a   : > { %1009 = vsyncadd (%p1115_p6), %s248_s30, 4294966272  ;;  %p285_p11 = scmp.lt.s32.totalorder %s1093_s5, 1  ;;  %v469_v0 = vlaneseq  ;;  %v882_v2 = vld [vmem:[%s1317_s2] sm:$0xff]   ;;  %v883_v3 = vld [vmem:[%s1317_s2 + $0x8] sm:$0xff]   ;;  %vm325_vm0 = vcmask 261120   ;;  %s442_s30 = sld [smem:[#allocation2]] }
  0x3b   : > { %818 = vmatprep.subr.bf16.mxu0 %v882_v2  ;;  %830 = vmatprep.subr.bf16.mxu1 %v882_v2  ;;  %v1198_v5 = vld [vmem:[%s251_s8] sm:$0xff]  ;;  %v1200_v6 = vld [vmem:[%s251_s8 + $0x8] sm:$0xff]  ;;  %v1209_v11 = vld [vmem:[%s251_s8 + $0x10] sm:$0xff]  ;;  %vm677_vm1 = vcmask 1041409   ;;  %vm679_vm2 = vcmask 1042434   ;;  %vm681_vm3 = vcmask 1043459  }
  0x3c   : > { %s286_s17 = scalar_select %p285_p11, %s1093_s5, 1  ;;  %v1186_v1 = vshrl.u32 %v469_v0, 7  ;;  %v1202_v7 = vld [vmem:[%s251_s8 + $0x20] sm:$0xff]  ;;  %819 = vmatpush3.bf16.msra.mxu0 %v882_v2  ;;  %832 = vmatpush3.bf16.msra.mxu1 %v882_v2  ;;  %v298_v9 = vpack.c.bf16 %v1200_v6, %v1198_v5  ;;  %v1207_v10 = vld [vmem:[%s251_s8 + $0x28] sm:$0xff]  ;;  %v1211_v12 = vld [vmem:[%s251_s8 + $0x18] sm:$0xff]  ;;  %vm683_vm4 = vcmask 1044484  }
  0x3d   : > { %820 = vmatprep.subr.bf16.mxu0 %v883_v3  ;;  %831 = vmatprep.subr.bf16.mxu1 %v883_v3  ;;  %v300_v13 = vpack.c.bf16 %v1207_v10, %v1202_v7  ;;  %v1215_v14 = vld [vmem:[%s251_s8 + $0x30] sm:$0xff]  ;;  %v1217_v15 = vld [vmem:[%s251_s8 + $0x38] sm:$0xff]  ;;  %v299_v19 = vpack.c.bf16 %v1211_v12, %v1209_v11  ;;  %v799_v25 = vld [vmem:[%s1318_s3] ss:$0 sm:$0xff]  ;;  %s797_s8 = sshll.u32 %s1176_s27, 3  ;;  %vm685_vm5 = vcmask 1045509  }
  0x3e   : > { %s798_s19 = sshll.u32 %s286_s17, 3  ;;  %v478_v4 = vsub.s32 1, %v1186_v1  ;;  %v471_v8 = vsub.s32 0, %v1186_v1  ;;  %v485_v17 = vsub.s32 2, %v1186_v1  ;;  %822 = vmatprep.mubr.msk.bf16.mxu0 %vm325_vm0, %v298_v9  ;;  %v301_v20 = vpack.c.bf16 %v1217_v15, %v1215_v14  ;;  %v806_v41 = vld [vmem:[%s1319_s4] ss:$0 sm:$0xff] }
  0x3f   : > { %s288_s9 = scalar_lea.vmem %s1316_s1, %s798_s19  ;;  %826 = vmatprep.mubr.msk.bf16.mxu1 %vm325_vm0, %v300_v13  ;;  %v492_v23 = vsub.s32 3, %v1186_v1  ;;  %v506_v56 = vsub.s32 5, %v1186_v1  ;;  %v499_v58 = vsub.s32 4, %v1186_v1  ;;  %v513_v60 = vsub.s32 6, %v1186_v1  ;;  %s808_s17 = sshll.u32 %s1093_s5, 7 }
  0x40   : > { %v1219_v16 = vld [vmem:[%s288_s9] sm:$0xff]  ;;  %821 = vmatpush3.bf16.msra.mxu0 %v883_v3  ;;  %833 = vmatpush3.bf16.msra.mxu1 %v883_v3  ;;  %v520_v2 = vsub.s32 7, %v1186_v1  ;;  %vm687_vm6 = vcmask 1046534   ;;  %s283_s19 = scalar_lea.vmem [#allocation6], %s797_s8  ;;  %vm689_vm7 = vcmask 1047559   ;;  %s1270_s12 = scalar_lea.hbm %s1321_s6, %s808_s17 }
  0x41   : > { %v479_v18 = vrot.slane %v1219_v16, %v478_v4  ;;  %v472_v21 = vrot.slane %v1219_v16, %v471_v8  ;;  %v486_v22 = vrot.slane %v1219_v16, %v485_v17  ;;  %v493_v24 = vrot.slane %v1219_v16, %v492_v23  ;;  %s707_s20 = sshll.u32 %s283_s19, 4  ;;  %s694_s5 = scalar_lea.sflag [#allocation5], %s1176_s27  ;;  %s1272_s20 = int_to_ptr.vmem [resolvable:$true] %s707_s20 }
  0x42   : > { %v507_v57 = vrot.slane %v1219_v16, %v506_v56  ;;  %v500_v59 = vrot.slane %v1219_v16, %v499_v58  ;;  %v514_v61 = vrot.slane %v1219_v16, %v513_v60  ;;  %v521_v3 = vrot.slane %v1219_v16, %v520_v2  ;;  %s962_s14 = scalar_lea.vmem %s1272_s20, 128  ;;  %p1328_p12 = scmp.ne.s32.totalorder %s1325_s10, 0 }
  0x43   : > { %481 = vbcast.lane.b32.xlu1 %v479_v18, 256  ;;  %474 = vbcast.lane.b32.xlu0 %v472_v21, 256  ;;  %p963_p6 = scmp.ne.s32.totalorder %s1272_s20, %s962_s14  ;;  %s1033_s15 = smov [#allocation6]  }
  0x44   : > { %823 = vmatmul.mubr.msk.bf16.vlgmr.msra.gmra.mrb[0].mxu0 %vm325_vm0, %v299_v19  ;;  %827 = vmatmul.mubr.msk.bf16.vlgmr.msra.gmra.mrb[0].mxu1 %vm325_vm0, %v301_v20  ;;  %s966_s9 = sshll.u32 %s1033_s15, 4  ;;  %s967_s9 = int_to_ptr.vmem [resolvable:$false] %s966_s9 }
  0x45   : > { %p964_p13 = pnand %p963_p6, %p1328_p12  ;;  %s968_s16 = scalar_lea.vmem %s967_s9, 256 }
  0x46   : > { %p969_p10 = scmp.lt.s32.totalorder %s1272_s20, %s967_s9  ;;  %p970_p0 = scmp.lt.s32.totalorder %s968_s16, %s962_s14 }
  0x47   : > { %488 = vbcast.lane.b32.xlu1 %v486_v22, 256  ;;  %v443_v22 = vstv %s442_s30  ;;  %p965_p8 = pneg %p964_p13 }
  0x48   : > { %p971_p2 = por %p970_p0, %p969_p10 }
  0x4a   : > { %p972_p4 = pnand %p971_p2, %p965_p8 }
  0x4b   : > { %495 = vbcast.lane.b32.xlu1 %v493_v24, 256 }
  0xb5   : > { %v475_v4 = vpop.permute.xlu0 %474  ;;  %v482_v9 = vpop.permute.xlu1 %481 }
  0xb9   : > { %v489_v17 = vpop.permute.xlu1 %488 }
  0xbd   : > { %v496_v19 = vpop.permute.xlu1 %495 }
 0x117   : > { %v824_v26 = vpop.f32.mrb[0].mxu0  ;;  %v828_v27 = vpop.f32.mrb[0].mxu1 }
 0x118   : > { %v381_v28 = vadd.f32 %v824_v26, %v799_v25  ;;  %v397_v29 = vadd.f32 %v828_v27, %v799_v25  ;;  %v372_v30 = vpop.f32.mrb[1].mxu0  ;;  %v388_v31 = vpop.f32.mrb[1].mxu1 }
 0x119   : > { %v373_v32 = vadd.f32 %v799_v25, %v372_v30  ;;  %v825_v33 = vpop.f32.mrb[2].mxu0  ;;  %v829_v34 = vpop.f32.mrb[2].mxu1  ;;  %v389_v39 = vadd.f32 %v799_v25, %v388_v31 }
 0x11a   : > { %884 = vtanh.f32 %v381_v28  ;;  %v384_v35 = vadd.f32 %v825_v33, %v799_v25  ;;  %v375_v36 = vpop.f32.mrb[3].mxu0  ;;  %v391_v37 = vpop.f32.mrb[3].mxu1  ;;  %v400_v38 = vadd.f32 %v829_v34, %v799_v25 }
 0x11b   : > { %886 = vtanh.f32 %v397_v29  ;;  %v376_v40 = vadd.f32 %v799_v25, %v375_v36  ;;  %v392_v62 = vadd.f32 %v799_v25, %v391_v37 }
 0x11c   : > { %888 = vtanh.f32 %v373_v32 }
 0x11d   : > { %890 = vtanh.f32 %v384_v35 }
 0x11e   : > { %892 = vtanh.f32 %v400_v38 }
 0x11f   : > { %894 = vtanh.f32 %v389_v39 }
 0x120   : > { %896 = vtanh.f32 %v376_v40 }
 0x121   : > { %898 = vtanh.f32 %v392_v62 }
 0x124   : > { %v885_v42 = vpop.eup %884 }
 0x125   : > { %v887_v43 = vpop.eup %886  ;;  %v420_v44 = vmul.f32 %v885_v42, %v806_v41 }
 0x126   : > { %v889_v45 = vpop.eup %888  ;;  %v424_v46 = vmul.f32 %v887_v43, %v806_v41 }
 0x127   : > { %v891_v47 = vpop.eup %890  ;;  %430 = vadd.xlane.f32.xlu1 %v420_v44  ;;  %v418_v50 = vmul.f32 %v889_v45, %v806_v41 }
 0x128   : > { %438 = vadd.xlane.f32.xlu0 %v424_v46  ;;  %v421_v48 = vmul.f32 %v891_v47, %v806_v41  ;;  %v893_v49 = vpop.eup %892 }
 0x129   : > { %v895_v51 = vpop.eup %894  ;;  %v425_v52 = vmul.f32 %v893_v49, %v806_v41 }
 0x12a   : > { %v422_v53 = vmul.f32 %v895_v51, %v806_v41  ;;  %v897_v54 = vpop.eup %896 }
 0x12b   : > { %432 = vadd.xlane.f32.xlu1 %v421_v48  ;;  %v419_v55 = vmul.f32 %v897_v54, %v806_v41  ;;  %v899_v63 = vpop.eup %898 }
 0x12c   : > { %426 = vadd.xlane.f32.xlu0 %v418_v50  ;;  %v423_v0 = vmul.f32 %v899_v63, %v806_v41 }
 0x12f   : > { %440 = vadd.xlane.f32.xlu1 %v425_v52 }
 0x130   : > { %434 = vadd.xlane.f32.xlu0 %v422_v53 }
 0x134   : > { %428 = vadd.xlane.f32.xlu0 %v419_v55 }
 0x140   : > { %509 = vbcast.lane.b32.xlu1 %v507_v57, 256 }
 0x14a   : > { %502 = vbcast.lane.b32.xlu0 %v500_v59, 256 }
 0x14e   : > { %516 = vbcast.lane.b32.xlu0 %v514_v61, 256 }
 0x164   : > { %436 = vadd.xlane.f32.xlu1 %v423_v0 }
 0x175   : > { %523 = vbcast.lane.b32.xlu1 %v521_v3, 256 }
 0x1b4   : > { %v431_v21 = vpop.xlane.xlu1 %430 }
 0x1b5   : > { %v439_v8 = vpop.xlane.xlu0 %438  ;;  %v446_v25 = vadd.f32 %v443_v22, %v431_v21 }
 0x1b6   : > { %v450_v31 = vadd.f32 %v443_v22, %v439_v8 }
 0x1b7   : > { %v456_v28 = vmul.f32 1.442695, %v446_v25 }
 0x1b8   : > { %v433_v26 = vpop.xlane.xlu1 %432  ;;  %v464_v33 = vmul.f32 1.442695, %v450_v31 }
 0x1b9   : > { %v427_v13 = vpop.xlane.xlu0 %426  ;;  %v447_v16 = vadd.f32 %v443_v22, %v433_v26 }
 0x1ba   : > { %v444_v24 = vadd.f32 %v443_v22, %v427_v13 }
 0x1bb   : > { %v458_v29 = vmul.f32 1.442695, %v447_v16 }
 0x1bc   : > { %v452_v1 = vmul.f32 1.442695, %v444_v24  ;;  %v441_v35 = vpop.xlane.xlu1 %440 }
 0x1bd   : > { %v435_v18 = vpop.xlane.xlu0 %434  ;;  %v451_v38 = vadd.f32 %v443_v22, %v441_v35 }
 0x1be   : > { %v448_v30 = vadd.f32 %v443_v22, %v435_v18 }
 0x1bf   : > { %v466_v44 = vmul.f32 1.442695, %v451_v38 }
 0x1c0   : > { %v460_v32 = vmul.f32 1.442695, %v448_v30  ;;  %v510_v55 = vpop.permute.xlu1 %509 }
 0x1c1   : > { %v429_v20 = vpop.xlane.xlu0 %428 }
 0x1c2   : > { %v445_v23 = vadd.f32 %v443_v22, %v429_v20 }
 0x1c4   : > { %v454_v27 = vmul.f32 1.442695, %v445_v23 }
 0x1c5   : > { %v503_v42 = vpop.permute.xlu0 %502 }
 0x1c6   : > { %900 = vpow2.f32 %v454_v27 }
 0x1c7   : > { %902 = vpow2.f32 %v452_v1 }
 0x1c8   : > { %904 = vpow2.f32 %v456_v28 }
 0x1c9   : > { %906 = vpow2.f32 %v458_v29  ;;  %v517_v53 = vpop.permute.xlu0 %516 }
 0x1ca   : > { %908 = vpow2.f32 %v460_v32 }
 0x1cb   : > { %910 = vpow2.f32 %v464_v33 }
 0x1cc   : > { %912 = vpow2.f32 %v466_v44 }
 0x1d0   : > { %v901_v34 = vpop.eup %900 }
 0x1d1   : > { %v903_v36 = vpop.eup %902  ;;  %v526_v39 = vmul.f32 %v901_v34, %v482_v9 }
 0x1d2   : > { %v905_v37 = vpop.eup %904  ;;  %v525_v40 = vmul.f32 %v903_v36, %v475_v4 }
 0x1d3   : > { %v527_v41 = vmul.f32 %v905_v37, %v489_v17  ;;  %v907_v43 = vpop.eup %906  ;;  %v539_v45 = vrot.slane %v526_v39, 4  ;;  %v590_v8 = vmul.f32 %v526_v39, %v1200_v6 }
 0x1d4   : > { %v533_v46 = vrot.slane %v525_v40, 4  ;;  %v528_v48 = vmul.f32 %v907_v43, %v496_v19  ;;  %v909_v49 = vpop.eup %908  ;;  %v589_v21 = vmul.f32 %v525_v40, %v1198_v5 }
 0x1d5   : > { %v545_v47 = vrot.slane %v527_v41, 4  ;;  %v540_v50 = vadd.f32 %v539_v45, %v526_v39  ;;  %v911_v51 = vpop.eup %910  ;;  %v529_v57 = vmul.f32 %v909_v49, %v503_v42  ;;  %v591_v60 = vmul.f32 %v527_v41, %v1209_v11 }
 0x1d6   : > { %v534_v52 = vadd.f32 %v533_v46, %v525_v40  ;;  %v551_v56 = vrot.slane %v528_v48, 4  ;;  %v531_v59 = vmul.f32 %v911_v51, %v517_v53  ;;  %v913_v19 = vpop.eup %912  ;;  %v592_v29 = vmul.f32 %v528_v48, %v1211_v12 }
 0x1d7   : > { %v546_v54 = vadd.f32 %v545_v47, %v527_v41  ;;  %v541_v58 = vrot.slane %v540_v50, 2  ;;  %v557_v2 = vrot.slane %v529_v57, 4  ;;  %v611_v13 = vsel %vm325_vm0, %v591_v60, 0.0 }
 0x1d8   : > { %v535_v61 = vrot.slane %v534_v52, 2  ;;  %v552_v0 = vadd.f32 %v551_v56, %v528_v48  ;;  %v569_v9 = vrot.slane %v531_v59, 4  ;;  %v612_v26 = vrot.slane %v611_v13, 4 }
 0x1d9   : > { %v547_v62 = vrot.slane %v546_v54, 2  ;;  %v542_v4 = vadd.f32 %v541_v58, %v540_v50  ;;  %v558_v24 = vadd.f32 %v557_v2, %v529_v57  ;;  %v597_v30 = vsel %vm325_vm0, %v589_v21, 0.0 }
 0x1da   : > { %v536_v17 = vadd.f32 %v535_v61, %v534_v52  ;;  %v553_v11 = vrot.slane %v552_v0, 2  ;;  %v570_v1 = vadd.f32 %v569_v9, %v531_v59  ;;  %v613_v34 = vadd.f32 %v612_v26, %v611_v13 }
 0x1db   : > { %v548_v20 = vadd.f32 %v547_v62, %v546_v54  ;;  %v543_v27 = vrot.slane %v542_v4, 1  ;;  %v559_v5 = vrot.slane %v558_v24, 2  ;;  %v598_v38 = vrot.slane %v597_v30, 4 }
 0x1dc   : > { %v537_v6 = vrot.slane %v536_v17, 1  ;;  %v554_v31 = vadd.f32 %v553_v11, %v552_v0  ;;  %v571_v36 = vrot.slane %v570_v1, 2  ;;  %v618_v41 = vsel %vm325_vm0, %v592_v29, 0.0 }
 0x1dd   : > { %v549_v16 = vrot.slane %v548_v20, 1  ;;  %v544_v35 = vadd.f32 %v543_v27, %v542_v4  ;;  %v560_v44 = vadd.f32 %v559_v5, %v558_v24  ;;  %v593_v12 = vmul.f32 %v529_v57, %v1202_v7 }
 0x1de   : > { %v538_v37 = vadd.f32 %v537_v6, %v536_v17  ;;  %v555_v42 = vrot.slane %v554_v31, 1  ;;  %v614_v45 = vrot.slane %v613_v34, 2  ;;  %v572_v47 = vadd.f32 %v571_v36, %v570_v1 }
 0x1df   : > { %v550_v40 = vadd.f32 %v549_v16, %v548_v20  ;;  %v582_v46 = vadd.f32 1e-08, %v544_v35  ;;  %v599_v50 = vadd.f32 %v598_v38, %v597_v30  ;;  %v595_v51 = vmul.f32 %v531_v59, %v1215_v14 }
 0x1e0   : > { %v581_v49 = vadd.f32 1e-08, %v538_v37  ;;  %v619_v54 = vrot.slane %v618_v41, 4  ;;  %v556_v60 = vadd.f32 %v555_v42, %v554_v31  ;;  %v561_v62 = vrot.slane %v560_v44, 1 }
 0x1e1   : > { %v583_v53 = vadd.f32 1e-08, %v550_v40  ;;  %v573_v7 = vrot.slane %v572_v47, 1  ;;  %v600_v2 = vrot.slane %v599_v50, 2  ;;  %v639_v14 = vsel %vm325_vm0, %v595_v51, 0.0 }
 0x1e2   : > { %v562_v13 = vadd.f32 %v561_v62, %v560_v44  ;;  %v640_v20 = vrot.slane %v639_v14, 4  ;;  %v615_v24 = vadd.f32 %v614_v45, %v613_v34 }
 0x1e4   : > { %v585_v1 = vadd.f32 1e-08, %v562_v13  ;;  %v641_v16 = vadd.f32 %v640_v20, %v639_v14 }
 0x1e6   : > { %v642_v40 = vrot.slane %v641_v16, 2 }
 0x1f1   : > { %v437_v63 = vpop.xlane.xlu1 %436 }
 0x1f2   : > { %v449_v3 = vadd.f32 %v443_v22, %v437_v63  ;;  %v604_v22 = vsel %vm325_vm0, %v590_v8, 0.0  ;;  %v625_v63 = vsel %vm325_vm0, %v593_v12, 0.0  ;;  %v620_v8 = vadd.f32 %v619_v54, %v618_v41 }
 0x1f3   : > { %v605_v32 = vrot.slane %v604_v22, 4 }
 0x1f4   : > { %v462_v18 = vmul.f32 1.442695, %v449_v3  ;;  %v626_v3 = vrot.slane %v625_v63, 4  ;;  %v621_v27 = vrot.slane %v620_v8, 2 }
 0x1f5   : > { %v524_v23 = vpop.permute.xlu1 %523  ;;  %v606_v43 = vadd.f32 %v605_v32, %v604_v22 }
 0x1f6   : > { %914 = vpow2.f32 %v462_v18  ;;  %v532_v25 = vmul.f32 %v913_v19, %v524_v23  ;;  %v584_v18 = vadd.f32 1e-08, %v556_v60  ;;  %v574_v19 = vadd.f32 %v573_v7, %v572_v47 }
 0x1f7   : > { %v607_v61 = vrot.slane %v606_v43, 2  ;;  %916 = vrcp.f32 %v582_v46  ;;  %v622_v37 = vadd.f32 %v621_v27, %v620_v8 }
 0x1f8   : > { %v575_v28 = vrot.slane %v532_v25, 4  ;;  %v596_v58 = vmul.f32 %v532_v25, %v1217_v15  ;;  %918 = vrcp.f32 %v581_v49 }
 0x1f9   : > { %v608_v9 = vadd.f32 %v607_v61, %v606_v43  ;;  %920 = vrcp.f32 %v583_v53  ;;  %v623_v46 = vrot.slane %v622_v37, 1 }
 0x1fa   : > { %v576_v33 = vadd.f32 %v575_v28, %v532_v25  ;;  %v646_v15 = vsel %vm325_vm0, %v596_v58, 0.0  ;;  %v627_v25 = vadd.f32 %v626_v3, %v625_v63  ;;  %922 = vrcp.f32 %v584_v18 }
 0x1fb   : > { %v647_v11 = vrot.slane %v646_v15, 4  ;;  %v609_v22 = vrot.slane %v608_v9, 1  ;;  %v587_v28 = vadd.f32 1e-08, %v574_v19  ;;  %924 = vrcp.f32 %v585_v1 }
 0x1fc   : > { %v577_v39 = vrot.slane %v576_v33, 2  ;;  %v624_v58 = vadd.f32 %v623_v46, %v622_v37 }
 0x1fd   : > { %v648_v32 = vadd.f32 %v647_v11, %v646_v15  ;;  %v610_v38 = vadd.f32 %v609_v22, %v608_v9  ;;  %926 = vrcp.f32 %v587_v28 }
 0x1fe   : > { %v578_v52 = vadd.f32 %v577_v39, %v576_v33  ;;  %v628_v33 = vrot.slane %v627_v25, 2  ;;  %v616_v39 = vrot.slane %v615_v24, 1 }
 0x1ff   : > { %v649_v44 = vrot.slane %v648_v32, 2 }
 0x200   : > { %v915_v48 = vpop.eup %914  ;;  %v579_v59 = vrot.slane %v578_v52, 1  ;;  %v629_v12 = vadd.f32 %v628_v33, %v627_v25  ;;  %v617_v49 = vadd.f32 %v616_v39, %v615_v24 }
 0x201   : > { %v530_v56 = vmul.f32 %v915_v48, %v510_v55  ;;  %v917_v5 = vpop.eup %916  ;;  %v650_v51 = vadd.f32 %v649_v44, %v648_v32 }
 0x202   : > { %v580_v23 = vadd.f32 %v579_v59, %v578_v52  ;;  %v919_v36 = vpop.eup %918  ;;  %v662_v43 = vmul.f32 %v917_v5, %v610_v38  ;;  %v630_v54 = vrot.slane %v629_v12, 1 }
 0x203   : > { %v563_v57 = vrot.slane %v530_v56, 4  ;;  %v594_v0 = vmul.f32 %v530_v56, %v1207_v10  ;;  %v601_v10 = vadd.f32 %v600_v2, %v599_v50  ;;  %v921_v45 = vpop.eup %920  ;;  %v643_v50 = vadd.f32 %v642_v40, %v641_v16 }
 0x204   : > { %v588_v31 = vadd.f32 1e-08, %v580_v23  ;;  %v923_v53 = vpop.eup %922  ;;  %v651_v7 = vrot.slane %v650_v51, 1  ;;  %v631_v2 = vadd.f32 %v630_v54, %v629_v12 }
 0x205   : > { %v564_v4 = vadd.f32 %v563_v57, %v530_v56  ;;  %v632_v55 = vsel %vm325_vm0, %v594_v0, 0.0  ;;  %v602_v30 = vrot.slane %v601_v10, 1  ;;  %v663_v56 = vmul.f32 %v921_v45, %v617_v49  ;;  %v925_v63 = vpop.eup %924 }
 0x206   : > { %v633_v17 = vrot.slane %v632_v55, 4  ;;  %928 = vrcp.f32 %v588_v31  ;;  %v644_v61 = vrot.slane %v643_v50, 1  ;;  %v664_v57 = vmul.f32 %v923_v53, %v624_v58 }
 0x207   : > { %v565_v21 = vrot.slane %v564_v4, 2  ;;  %v603_v42 = vadd.f32 %v602_v30, %v601_v10  ;;  %v927_v0 = vpop.eup %926  ;;  %v652_v8 = vadd.f32 %v651_v7, %v650_v51 }
 0x208   : > { %v634_v6 = vadd.f32 %v633_v17, %v632_v55  ;;  %v665_v55 = vmul.f32 %v925_v63, %v631_v2  ;;  %v645_v15 = vadd.f32 %v644_v61, %v643_v50 }
 0x209   : > { %v566_v26 = vadd.f32 %v565_v21, %v564_v4  ;;  %v661_v47 = vmul.f32 %v919_v36, %v603_v42 }
 0x20a   : > { %v635_v34 = vrot.slane %v634_v6, 2  ;;  %v667_v13 = vmul.f32 %v927_v0, %v645_v15 }
 0x20b   : > { %v567_v29 = vrot.slane %v566_v26, 1  ;;  %v678_v52 = vsel %vm677_vm1, %v662_v43, %v661_v47 }
 0x20c   : > { %v636_v48 = vadd.f32 %v635_v34, %v634_v6  ;;  %v680_v62 = vsel %vm679_vm2, %v663_v56, %v678_v52 }
 0x20d   : > { %v568_v35 = vadd.f32 %v567_v29, %v566_v26  ;;  %v682_v3 = vsel %vm681_vm3, %v664_v57, %v680_v62 }
 0x20e   : > { %v637_v60 = vrot.slane %v636_v48, 1  ;;  %v684_v17 = vsel %vm683_vm4, %v665_v55, %v682_v3 }
 0x20f   : > { %v586_v41 = vadd.f32 1e-08, %v568_v35 }
 0x210   : > { %v929_v14 = vpop.eup %928  ;;  %v638_v59 = vadd.f32 %v637_v60, %v636_v48 }
 0x211   : > { %930 = vrcp.f32 %v586_v41  ;;  %v668_v18 = vmul.f32 %v929_v14, %v652_v8 }
 0x21b   : > { %v931_v4 = vpop.eup %930 }
 0x21c   : > { %v666_v9 = vmul.f32 %v931_v4, %v638_v59 }
 0x21e   : > { %v686_v19 = vsel %vm685_vm5, %v666_v9, %v684_v17 }
 0x21f   : > { %v688_v20 = vsel %vm687_vm6, %v667_v13, %v686_v19 }
 0x220   : > { %v690_v21 = vsel %vm689_vm7, %v668_v18, %v688_v20 }
 0x221   : > { %692 = vst.msk [vmem:[%s283_s19] sm:$0xff] %vm325_vm0, %v690_v21 }
 0x222   : > { %975 = shalt.err (!%p972_p4)
}
 0x223   : > { %s976_s27 = scalar_lea.hbm %s1270_s12, 128  ;;  %s980_s29 = scalar_lea.hbm %s1321_s6, 256 }
 0x224   : > { %p977_p5 = scmp.ne.s32.totalorder %s1270_s12, %s976_s27  ;;  %p981_p1 = scmp.lt.u32.totalorder %s1270_s12, %s1321_s6 }
 0x225   : > { %p982_p3 = scmp.lt.u32.totalorder %s980_s29, %s976_s27  ;;  %p984_p6 = scmp.lt.u32.totalorder %s976_s27, %s1270_s12 }
 0x226   : > { %p978_p7 = pnand %p977_p5, %p1328_p12 }
 0x227   : > { %p983_p11 = por %p982_p3, %p981_p1 }
 0x228   : > { %p979_p9 = pneg %p978_p7 }
 0x229   : > { %p985_p13 = por %p984_p6, %p983_p11 }
 0x22b   : > { %p986_p8 = pnand %p985_p13, %p979_p9 }
 0x22d   : > { %989 = shalt.err (!%p986_p8)
}
 0x22e   : > { %836 = dma.vmem_to_hbm [thread:$0]  (%p1328_p12), %s1272_s20, 128, %s1270_s12, %s694_s5  }
 0x22f PF: > { %s719_s17 = sand.u32 1, %s1016_s23   ;;  %p1329_p10 = scmp.ne.s32.totalorder %s1326_s11, 0 }
 0x230   : > { %p1330_p0 = scmp.ge.s32.totalorder %s1028_s26, 2  ;;  %s720_s19 = scalar_lea.sflag [#allocation5], %s719_s17 }
 0x232   : > { %p843_p2 = pnand %p1330_p0, %p1329_p10 }
 0x234   : > { %1011 = dma.done.wait (!%p843_p2), %s720_s19, 128  }
 0x235   : > { %1013 = vsyncadd (!%p843_p2), %s720_s19, 4294967168  ;;  %p20_p4 = scmp.ge.s32.totalorder %s1097_s28, 4   ;;  %s1331_s23 = smov %s1020_s24 }
 0x236   : > { %s1332_s24 = smov %s1024_s25  ;;  %s1333_s25 = smov %s1109_s7 }
 0x237   : > { %s1334_s26 = smov %s1097_s28  ;;  %22 = sbr.rel (!%p20_p4) target bundleno = 7 (0x7), region = 92 }
 0x23e   :  { %725 = vsyncpa [#allocation4], 1 }
 0x23f   :  { %727 = vsyncpa [#allocation4 + $0x1], 1 }
 0x240   :  { %728 = vsyncpa [#allocation5], 1 }
 0x241   :  { %730 = vsyncpa [#allocation5 + $0x1], 1 }

</bundles_post_ra>
